<compile_context>
chip_gen: v7x
topology: tpu7x:2x2x1
jax: 0.10.0
libtpu: 0.0.40
codegen_flags: <defaults>
</compile_context>

<pallas_src>
import functools

import jax
import jax.numpy as jnp
from jax.experimental import pallas as pl
from jax.experimental.pallas import tpu as pltpu

NEG_SLOPE = 0.01   # nn.LeakyReLU default
BN_EPS = 1e-5      # nn.BatchNorm2d default


def _stage_compute(x, w_ref, b_ref, m_ref, pad):
    """One fused Conv+BN+LeakyReLU stage on the whole (batch-folded) slab.

    x:      (M, W*Cin)           f32   M = N*H rows (batch folded onto sublanes)
    w_ref:  (KH*W*Cin, W*Cout)   bf16  banded weight (KW taps + circular W wrap
                                       + BN scale folded in), kh-major K layout
    b_ref:  (1, W*Cout)          f32   conv bias + BN shift, tiled over W
    m_ref:  (KH, M, 1)           f32   {0,1} row mask: zero where the kh-shift
                                       crosses a sample's H boundary (zero H-pad)
    returns (M, W*Cout)          f32
    """
    M = x.shape[0]
    KH = 2 * pad + 1

    # Build the KH H-shifted views with XLU rolls + row masks (no padded copy,
    # no misaligned sublane slices), then fuse them along K so the whole stage
    # is ONE fat MXU matmul.
    views = []
    for kh in range(KH):
        d = kh - pad
        if d == 0:
            views.append(x)
        else:
            v = pltpu.roll(x, shift=(-d) % M, axis=0)   # row r <- row (r + d) mod M
            views.append(v * m_ref[kh])                 # zero rows that crossed a sample edge
    x_cat = jnp.concatenate(views, axis=-1).astype(w_ref.dtype)   # (M, KH*W*Cin) bf16

    acc = jnp.dot(x_cat, w_ref[...], preferred_element_type=jnp.float32)
    y = acc + b_ref[...]                                # single (M,128) VPU bias add
    return jnp.where(y > 0, y, NEG_SLOPE * y)           # LeakyReLU


def _cbr_kernel(x_ref, m_ref, *refs, pad, n_stages):
    """Fused polar_CBR: 1 or 2 Conv+BN+LeakyReLU stages, whole batch per call."""
    o_ref = refs[-1]
    y = x_ref[...]                                      # (M, W*Cin) f32
    for s in range(n_stages):
        y = _stage_compute(y, refs[2 * s], refs[2 * s + 1], m_ref, pad)
    # Lane-dense store: last dim is W*Cout (= 128 for the tested shapes).
    o_ref[...] = y.astype(o_ref.dtype)


def _polar_cbr_call(x2d, mask, stages, padding):
    """x2d: (M, W*Cin) f32; mask: (KH, M, 1) f32; stages: [(w bf16, b f32), ...]."""
    M = x2d.shape[0]
    WCout = stages[-1][0].shape[1]

    flops = sum(2 * M * w.shape[0] * w.shape[1] for w, _ in stages)
    bytes_accessed = (x2d.size * 4 + mask.size * 4 + M * WCout * 2
                      + sum(w.size * 2 + b.size * 4 for w, b in stages))

    args = [x2d, mask] + [a for st in stages for a in st]
    kernel = functools.partial(_cbr_kernel, pad=padding, n_stages=len(stages))

    # No grid: the batch lives on the M/sublane axis, so a single kernel step does
    # everything (no per-step overhead on 1-TC chips, weights loaded exactly once).
    return pl.pallas_call(
        kernel,
        out_shape=jax.ShapeDtypeStruct((M, WCout), jnp.bfloat16),
        in_specs=[pl.BlockSpec(memory_space=pltpu.MemorySpace.VMEM) for _ in args],
        out_specs=pl.BlockSpec(memory_space=pltpu.MemorySpace.VMEM),
        cost_estimate=pl.CostEstimate(flops=flops, transcendentals=0,
                                      bytes_accessed=bytes_accessed),
    )(*args)


def _build_banded_weight(w, scale, W, pad):
    """Fold the KW taps, the circular W wrap and the BN scale into one banded matrix.

    banded[kh*W*Cin + i*Cin + c, wo*Cout + o] = w[kh, kw, c, o] * scale[o]
        for the kw such that i == (wo + kw - pad) mod W.
    """
    KH, KW, Cin, Cout = w.shape
    wf = w * scale[None, None, None, :]                    # fold BN scale into weights
    wo = jnp.arange(W)
    kw = jnp.arange(KW)
    src = (wo[None, :] + kw[:, None] - pad) % W            # (KW, W_out): input col per tap
    sel = (jnp.arange(W)[None, :, None] == src[:, None, :]).astype(w.dtype)   # (KW, W_in, W_out)
    banded = jnp.einsum("qiw,kqco->kicwo", sel, wf)        # (KH, W_in, Cin, W_out, Cout)
    return banded.reshape(KH * W * Cin, W * Cout)          # kh-major K layout


def _build_row_mask(N, H, pad):
    """(KH, N*H, 1) {0,1} mask: mask[kh, r] = 1 iff row r shifted by (kh - pad)
    stays inside its own sample (this realizes the conv's zero H-padding)."""
    KH = 2 * pad + 1
    h = jnp.arange(N * H) % H                              # row index within its sample
    d = jnp.arange(KH)[:, None] - pad                      # (KH, 1) H-offsets per tap
    valid = (h[None, :] + d >= 0) & (h[None, :] + d < H)
    return valid.astype(jnp.float32)[:, :, None]           # (KH, N*H, 1)


@functools.partial(jax.jit, static_argnames=("double_version", "padding", "stride"))
def polar_cbr_forward(x_nchw, params, double_version=False, padding=1, stride=1):
    """Matches polar_CBR.forward (stride=1, inference-mode BatchNorm). x: (N,C,H,W) f32.

    NOTE: BatchNorm uses folded running statistics (eval mode); training-mode BN
    is not implemented (TODO(synk)).
    """
    if stride != 1:
        raise NotImplementedError("polar_CBR Pallas kernel: only stride=1 is supported")
    N, Cin, H, W = x_nchw.shape

    # NCHW -> (N*H, W*Cin) lane-dense slab (one XLA transpose).
    # TODO(synk): keep activations in this layout (and bf16) across consecutive
    # polar_CBR layers, converting only at model boundaries.
    x2d = jnp.transpose(x_nchw, (0, 2, 3, 1)).reshape(N * H, W * Cin)

    def prep(pr):
        KH, KW, _, cout = pr["w"].shape
        if KH != 2 * padding + 1 or KW != KH:
            raise NotImplementedError("only kernel_size == 2*padding + 1 supported")
        scale = pr["gamma"] * jax.lax.rsqrt(pr["var"] + BN_EPS)
        bias = pr["beta"] + (pr["b"] - pr["mean"]) * scale
        bw = _build_banded_weight(pr["w"], scale, W, padding).astype(jnp.bfloat16)
        bb = jnp.tile(bias, W).reshape(1, W * cout).astype(jnp.float32)
        return bw, bb

    stages = [prep(params["conv1"])]
    if double_version:
        stages.append(prep(params["conv2"]))

    mask = _build_row_mask(N, H, padding)                  # (KH, N*H, 1) f32

    y2d = _polar_cbr_call(x2d, mask, stages, padding)      # (N*H, W*Cout) bf16
    Cout = stages[-1][0].shape[1] // W
    y = y2d.reshape(N, H, W, Cout)
    return jnp.transpose(y, (0, 3, 1, 2)).astype(jnp.float32)   # -> NCHW f32


def init_params(key, in_ch, out_ch, kernel_size=3):
    """Deterministic synthetic params for conv1/conv2 + their BatchNorms (HWIO weights)."""
    def stage(k, cin, cout):
        kw_, kb_, km_, kv_, kg_, kbet_ = jax.random.split(k, 6)
        w = 0.1 * jax.random.normal(kw_, (kernel_size, kernel_size, cin, cout), jnp.float32)
        b = 0.1 * jax.random.normal(kb_, (cout,), jnp.float32)
        mean = 0.05 * jax.random.normal(km_, (cout,), jnp.float32)
        var = 1.0 + 0.1 * jax.random.uniform(kv_, (cout,), jnp.float32)
        gamma = 1.0 + 0.1 * jax.random.normal(kg_, (cout,), jnp.float32)
        beta = 0.1 * jax.random.normal(kbet_, (cout,), jnp.float32)
        return dict(w=w, b=b, mean=mean, var=var, gamma=gamma, beta=beta)

    k1, k2 = jax.random.split(key)
    return {"conv1": stage(k1, in_ch, out_ch), "conv2": stage(k2, out_ch, out_ch)}


def _reference_forward(x_nchw, params, double_version, padding):
    """Plain-JAX f32 reference of polar_CBR.forward (inference-mode BN)."""
    def stage(x, pr):
        p = padding
        scale = pr["gamma"] / jnp.sqrt(pr["var"] + BN_EPS)
        bias = pr["beta"] + (pr["b"] - pr["mean"]) * scale
        xw = jnp.concatenate([x[..., -p:], x, x[..., :p]], axis=-1)     # circular W pad
        xp = jnp.pad(xw, ((0, 0), (0, 0), (p, p), (0, 0)))              # zero H pad
        y = jax.lax.conv_general_dilated(
            xp, pr["w"], window_strides=(1, 1), padding="VALID",
            dimension_numbers=("NCHW", "HWIO", "NCHW"))
        y = y * scale[None, :, None, None] + bias[None, :, None, None]
        return jnp.where(y > 0, y, NEG_SLOPE * y)

    y = stage(x_nchw, params["conv1"])
    if double_version:
        y = stage(y, params["conv2"])
    return y


if __name__ == "__main__":
    key = jax.random.PRNGKey(0)
    k_x, k_p = jax.random.split(key)

    N, in_ch, out_ch, H, W = 2, 4, 8, 16, 16
    x = jax.random.normal(k_x, (N, in_ch, H, W), jnp.float32)
    params = init_params(k_p, in_ch, out_ch)

    # default constructor path (double_version=False) and the fused two-conv path
    y_single = polar_cbr_forward(x, params, double_version=False)
    y_double = polar_cbr_forward(x, params, double_version=True)
    jax.block_until_ready(y_single)
    jax.block_until_ready(y_double)

    assert y_single.shape == (N, out_ch, H, W), y_single.shape
    assert y_double.shape == (N, out_ch, H, W), y_double.shape

    # Numeric check vs the f32 reference.  Tolerance tightened from 0.1 to 2e-2:
    # loose enough for the bf16 matmul inputs / bf16 output, tight enough to
    # catch any indexing / layout bug (those give O(1) errors).
    for dv, y in ((False, y_single), (True, y_double)):
        y_ref = _reference_forward(x, params, dv, 1)
        err = jnp.max(jnp.abs(y - y_ref)) / (jnp.max(jnp.abs(y_ref)) + 1e-6)
        assert float(err) < 2e-2, ("mismatch", dv, float(err))

    print("KERNEL_OK")
</pallas_src>

<mosaic_0001>
module attributes {stable_mosaic.version = 11 : i64} {
  func.func @_cbr_kernel(%arg0: memref<32x64xf32, #tpu.memory_space<vmem>>, %arg1: memref<3x32x1xf32, #tpu.memory_space<vmem>>, %arg2: memref<192x128xbf16, #tpu.memory_space<vmem>>, %arg3: memref<1x128xf32, #tpu.memory_space<vmem>>, %arg4: memref<32x128xbf16, #tpu.memory_space<vmem>>) attributes {dimension_semantics = [], scalar_prefetch = 0 : i64, scratch_operands = 0 : i64, tpu.core_type = #tpu.core_type<tc>} {
    %c0 = arith.constant 0 : index
    %c0_0 = arith.constant 0 : index
    %0 = vector.load %arg0[%c0, %c0_0] : memref<32x64xf32, #tpu.memory_space<vmem>>, vector<32x64xf32>
    %c1_i32 = arith.constant 1 : i32
    %1 = tpu.dynamic_rotate %0 by %c1_i32 dim 0 : vector<32x64xf32>, i32 -> vector<32x64xf32>
    %c0_1 = arith.constant 0 : index
    %c0_2 = arith.constant 0 : index
    %c0_3 = arith.constant 0 : index
    %2 = vector.load %arg1[%c0_1, %c0_2, %c0_3] : memref<3x32x1xf32, #tpu.memory_space<vmem>>, vector<1x32x1xf32>
    %3 = vector.shape_cast %2 : vector<1x32x1xf32> to vector<32x1xf32>
    %4 = vector.broadcast %3 : vector<32x1xf32> to vector<32x64xf32>
    %5 = arith.mulf %1, %4 : vector<32x64xf32>
    %c31_i32 = arith.constant 31 : i32
    %6 = tpu.dynamic_rotate %0 by %c31_i32 dim 0 : vector<32x64xf32>, i32 -> vector<32x64xf32>
    %c2 = arith.constant 2 : index
    %c0_4 = arith.constant 0 : index
    %c0_5 = arith.constant 0 : index
    %7 = vector.load %arg1[%c2, %c0_4, %c0_5] : memref<3x32x1xf32, #tpu.memory_space<vmem>>, vector<1x32x1xf32>
    %8 = vector.shape_cast %7 : vector<1x32x1xf32> to vector<32x1xf32>
    %9 = vector.broadcast %8 : vector<32x1xf32> to vector<32x64xf32>
    %10 = arith.mulf %6, %9 : vector<32x64xf32>
    %11 = tpu.concatenate %5, %0, %10 in 1 : vector<32x64xf32>, vector<32x64xf32>, vector<32x64xf32> -> vector<32x192xf32>
    %12 = arith.truncf %11 : vector<32x192xf32> to vector<32x192xbf16>
    %c0_6 = arith.constant 0 : index
    %c0_7 = arith.constant 0 : index
    %13 = vector.load %arg2[%c0_6, %c0_7] : memref<192x128xbf16, #tpu.memory_space<vmem>>, vector<192x128xbf16>
    %cst = arith.constant dense<0.000000e+00> : vector<32x128xf32>
    %14 = tpu.matmul %12, %13, %cst {dimension_numbers = #tpu.dot_dimension_numbers<[1], [0], [0], [1], [0, 0, 1, 1], [], []>} : vector<32x192xbf16>, vector<192x128xbf16>, vector<32x128xf32> -> vector<32x128xf32>
    %c0_8 = arith.constant 0 : index
    %c0_9 = arith.constant 0 : index
    %15 = vector.load %arg3[%c0_8, %c0_9] : memref<1x128xf32, #tpu.memory_space<vmem>>, vector<1x128xf32>
    %16 = vector.broadcast %15 : vector<1x128xf32> to vector<32x128xf32>
    %17 = arith.addf %14, %16 : vector<32x128xf32>
    %cst_10 = arith.constant 0.000000e+00 : f32
    %18 = vector.broadcast %cst_10 : f32 to vector<32x128xf32>
    %19 = arith.cmpf ogt, %17, %18 : vector<32x128xf32>
    %cst_11 = arith.constant 0.00999999977 : f32
    %20 = vector.broadcast %cst_11 : f32 to vector<32x128xf32>
    %21 = arith.mulf %20, %17 : vector<32x128xf32>
    %22 = arith.select %19, %17, %21 : vector<32x128xi1>, vector<32x128xf32>
    %23 = arith.truncf %22 : vector<32x128xf32> to vector<32x128xbf16>
    %c0_12 = arith.constant 0 : index
    %c0_13 = arith.constant 0 : index
    %24 = vector.load %arg4[%c0_12, %c0_13] : memref<32x128xbf16, #tpu.memory_space<vmem>>, vector<32x128xbf16>
    tpu.vector_store %arg4[%c0_12, %c0_13], %23 {strides = array<i32>} : memref<32x128xbf16, #tpu.memory_space<vmem>>, vector<32x128xbf16>,
    return
  }
}

</mosaic_0001>

<bundles_post_ra>
// kernel: tile.8
= control target key start
LH: loop header
LB: loop body
LE: loop exit
PB: predicated region body
PF: predicated region fallthrough
CT: control target
= control target key end

     0   :  { %s28_s0 = inlined_call_operand.vmem [shape: f32[8], index: 0, kind: input, shape index: {}]   ;;  %s29_s1 = inlined_call_operand.vmem [shape: f32[16,8], index: 1, kind: output, shape index: {}]  }
   0x1   :  { %v4_v0 = vld [vmem:[%s28_s0] ss:$0 sm:$0xff] }
   0x2   :  { %5 = vst [vmem:[%s29_s1] sm:$0xff] %v4_v0  ;;  %8 = vst [vmem:[%s29_s1 + $0x8] sm:$0xff] %v4_v0 }

// kernel: tile.9
= control target key start
LH: loop header
LB: loop body
LE: loop exit
PB: predicated region body
PF: predicated region fallthrough
CT: control target
= control target key end

     0   :  { %s131_s10 = smov 120   ;;  %s132_s11 = smov 104   ;;  %vm3_vm0 = vcmask 64512   ;;  %vm9_vm1 = vcmask 1048512   ;;  %vm15_vm2 = vcmask 982912   ;;  %vm21_vm3 = vcmask 917312   ;;  %s207_s0 = inlined_call_operand.vmem [shape: f32[16,8], index: 0, kind: input, shape index: {}]   ;;  %s208_s1 = inlined_call_operand.vmem [shape: f32[1,128], index: 1, kind: output, shape index: {}]  }
   0x1   :  { %v101_v0 = vld [vmem:[%s207_s0 + $0xf] sm:$0x1]   ;;  %v103_v1 = vld [vmem:[%s207_s0 + $0xd] sm:$0x1]   ;;  %v102_v2 = vld [vmem:[%s207_s0 + $0xe] sm:$0x1]  }
   0x2   :  { %7 = vrot.lane.b32.xlu0 %v101_v0, %s131_s10  ;;  %19 = vrot.lane.b32.xlu1 %v103_v1, %s132_s11  ;;  %v104_v3 = vld [vmem:[%s207_s0 + $0xc] sm:$0x1]   ;;  %s133_s16 = smov 112   ;;  %s134_s17 = smov 96   ;;  %v105_v4 = vld [vmem:[%s207_s0 + $0xb] sm:$0x1]  }
   0x3   :  { %v106_v5 = vld [vmem:[%s207_s0 + $0xa] sm:$0x1]   ;;  %v2_v6 = vld [vmem:[%s207_s0] sm:$0x1]   ;;  %s135_s24 = smov 88   ;;  %s136_s25 = smov 80  }
   0x4   :  { %4 = vst.msk [vmem:[#allocation0] sm:$0x1] %vm3_vm0, %v2_v6   ;;  %v107_v7 = vld [vmem:[%s207_s0 + $0x9] sm:$0x1]   ;;  %v108_v8 = vld [vmem:[%s207_s0 + $0x8] sm:$0x1]  }
   0x5   :  { %s137_s30 = smov 72   ;;  %s138_s2 = smov 64   ;;  %v109_v9 = vld [vmem:[%s207_s0 + $0x7] sm:$0x1]   ;;  %v110_v10 = vld [vmem:[%s207_s0 + $0x6] sm:$0x1]  }
   0x6   :  { %13 = vrot.lane.b32.xlu0 %v102_v2, %s133_s16  ;;  %25 = vrot.lane.b32.xlu1 %v104_v3, %s134_s17  ;;  %s139_s7 = smov 56   ;;  %s140_s8 = smov 48   ;;  %v111_v11 = vld [vmem:[%s207_s0 + $0x5] sm:$0x1]   ;;  %v112_v12 = vld [vmem:[%s207_s0 + $0x4] sm:$0x1]  }
   0x7   :  { %s141_s13 = smov 40   ;;  %s142_s14 = smov 32   ;;  %v113_v13 = vld [vmem:[%s207_s0 + $0x3] sm:$0x1]   ;;  %v114_v14 = vld [vmem:[%s207_s0 + $0x2] sm:$0x1]  }
   0x8   :  { %s143_s19 = smov 24   ;;  %s144_s20 = smov 16   ;;  %v115_v15 = vld [vmem:[%s207_s0 + $0x1] sm:$0x1]   ;;  %vm27_vm4 = vcmask 851712   ;;  %vm33_vm5 = vcmask 786112  }
   0x9   :  { %s145_s0 = smov 8   ;;  %vm39_vm6 = vcmask 720512   ;;  %vm45_vm7 = vcmask 654912   ;;  %vm51_vm8 = vcmask 589312   ;;  %vm57_vm9 = vcmask 523712  }
   0xa   :  { %31 = vrot.lane.b32.xlu0 %v105_v4, %s135_s24  ;;  %37 = vrot.lane.b32.xlu1 %v106_v5, %s136_s25  ;;  %vm63_vm10 = vcmask 458112   ;;  %vm69_vm11 = vcmask 392512   ;;  %vm75_vm12 = vcmask 326912   ;;  %vm81_vm13 = vcmask 261312  }
   0xb   :  { %vm87_vm14 = vcmask 195712   ;;  %vm93_vm15 = vcmask 130112  }
   0xe   :  { %43 = vrot.lane.b32.xlu0 %v107_v7, %s137_s30  ;;  %49 = vrot.lane.b32.xlu1 %v108_v8, %s138_s2 }
  0x12   :  { %55 = vrot.lane.b32.xlu0 %v109_v9, %s139_s7  ;;  %61 = vrot.lane.b32.xlu1 %v110_v10, %s140_s8 }
  0x16   :  { %67 = vrot.lane.b32.xlu0 %v111_v11, %s141_s13  ;;  %73 = vrot.lane.b32.xlu1 %v112_v12, %s142_s14 }
  0x1a   :  { %79 = vrot.lane.b32.xlu0 %v113_v13, %s143_s19  ;;  %85 = vrot.lane.b32.xlu1 %v114_v14, %s144_s20 }
  0x1e   :  { %91 = vrot.lane.b32.xlu0 %v115_v15, %s145_s0 }
  0x74   :  { %v8_v16 = vpop.permute.xlu0 %7   ;;  %v20_v17 = vpop.permute.xlu1 %19  }
  0x75   :  { %10 = vst.msk [vmem:[#allocation0] sm:$0x1] %vm9_vm1, %v8_v16  }
  0x78   :  { %v14_v18 = vpop.permute.xlu0 %13   ;;  %v26_v19 = vpop.permute.xlu1 %25  }
  0x79   :  { %16 = vst.msk [vmem:[#allocation0] sm:$0x1] %vm15_vm2, %v14_v18  }
  0x7a   :  { %22 = vst.msk [vmem:[#allocation0] sm:$0x1] %vm21_vm3, %v20_v17  }
  0x7b   :  { %28 = vst.msk [vmem:[#allocation0] sm:$0x1] %vm27_vm4, %v26_v19  }
  0x7c   :  { %v32_v20 = vpop.permute.xlu0 %31   ;;  %v38_v21 = vpop.permute.xlu1 %37  }
  0x7d   :  { %34 = vst.msk [vmem:[#allocation0] sm:$0x1] %vm33_vm5, %v32_v20  }
  0x7e   :  { %40 = vst.msk [vmem:[#allocation0] sm:$0x1] %vm39_vm6, %v38_v21  }
  0x80   :  { %v44_v22 = vpop.permute.xlu0 %43   ;;  %v50_v23 = vpop.permute.xlu1 %49  }
  0x81   :  { %46 = vst.msk [vmem:[#allocation0] sm:$0x1] %vm45_vm7, %v44_v22  }
  0x82   :  { %52 = vst.msk [vmem:[#allocation0] sm:$0x1] %vm51_vm8, %v50_v23  }
  0x84   :  { %v56_v24 = vpop.permute.xlu0 %55   ;;  %v62_v25 = vpop.permute.xlu1 %61  }
  0x85   :  { %58 = vst.msk [vmem:[#allocation0] sm:$0x1] %vm57_vm9, %v56_v24  }
  0x86   :  { %64 = vst.msk [vmem:[#allocation0] sm:$0x1] %vm63_vm10, %v62_v25  }
  0x88   :  { %v68_v26 = vpop.permute.xlu0 %67   ;;  %v74_v27 = vpop.permute.xlu1 %73  }
  0x89   :  { %70 = vst.msk [vmem:[#allocation0] sm:$0x1] %vm69_vm11, %v68_v26  }
  0x8a   :  { %76 = vst.msk [vmem:[#allocation0] sm:$0x1] %vm75_vm12, %v74_v27  }
  0x8c   :  { %v80_v28 = vpop.permute.xlu0 %79   ;;  %v86_v29 = vpop.permute.xlu1 %85  }
  0x8d   :  { %82 = vst.msk [vmem:[#allocation0] sm:$0x1] %vm81_vm13, %v80_v28  }
  0x8e   :  { %88 = vst.msk [vmem:[#allocation0] sm:$0x1] %vm87_vm14, %v86_v29  }
  0x90   :  { %v92_v30 = vpop.permute.xlu0 %91  }
  0x91   :  { %94 = vst.msk [vmem:[#allocation0] sm:$0x1] %vm93_vm15, %v92_v30  }
  0x98   :  { %v98_v31 = vld [vmem:[#allocation0] sm:$0x1] }
  0x99   :  { %100 = vst [vmem:[%s208_s1] sm:$0x1] %v98_v31 }

// kernel: polar_cbr_forward.1
= control target key start
LH: loop header
LB: loop body
LE: loop exit
PB: predicated region body
PF: predicated region fallthrough
CT: control target
= control target key end

     0   :  { %v26_v0 = vlaneseq  ;;  %v406_v1 = vmov 0   ;;  %s407_s19 = smov 64   ;;  %vm115_vm2 = vcmask 523264   ;;  %s578_s1 = inlined_call_operand.vmem [shape: f32[3,32,1], index: 1, kind: input, shape index: {}]   ;;  %s579_s0 = inlined_call_operand.vmem [shape: f32[32,64], index: 0, kind: input, shape index: {}]   ;;  %s580_s2 = inlined_call_operand.vmem [shape: bf16[192,128], index: 2, kind: input, shape index: {}]   ;;  %s581_s3 = inlined_call_operand.vmem [shape: f32[1,128], index: 3, kind: input, shape index: {}]   ;;  %s582_s4 = inlined_call_operand.vmem [shape: bf16[32,128], index: 4, kind: output, shape index: {}]  }
   0x1   :  { %383 = vset.pattern.permute.xlu1 %v406_v1  ;;  %382 = vset.pattern.permute.xlu0 %v406_v1  ;;  %v35_v2 = vld [vmem:[%s578_s1 + $0x10] sm:$0xff]  ;;  %v33_v3 = vld [vmem:[%s578_s1] sm:$0xff]  ;;  %v36_v5 = vld [vmem:[%s578_s1 + $0x18] sm:$0xff] }
   0x2   :  { %49 = vperm.xlu1 %383, %v35_v2   ;;  %39 = vperm.xlu0 %382, %v33_v3   ;;  %v27_v4 = vshrl.u32 %v26_v0, 7  ;;  %v34_v6 = vld [vmem:[%s578_s1 + $0x8] sm:$0xff]  ;;  %v20_v7 = vld [vmem:[%s579_s0 + $0x10] sm:$0xff]  ;;  %v18_v8 = vld [vmem:[%s579_s0] sm:$0xff] }
   0x3   :  { %233 = vmatprep.subr.bf16.mxu0 %v406_v1  ;;  %356 = vmatprep.subr.bf16.mxu1 %v406_v1  ;;  %v19_v9 = vld [vmem:[%s579_s0 + $0x8] sm:$0xff]  ;;  %v24_v10 = vrot.slane %v20_v7, 7  ;;  %v318_v12 = vld [vmem:[%s578_s1 + $0x40] sm:$0xff]  ;;  %v21_v15 = vld [vmem:[%s579_s0 + $0x18] sm:$0xff]  ;;  %v22_v16 = vrot.slane %v18_v8, 7  ;;  %v63_v26 = vrot.slane %v20_v7, 1 }
   0x4   :  { %vm28_vm0 = vcmp.lt.s32.totalorder %v27_v4, 1  ;;  %v319_v11 = vld [vmem:[%s578_s1 + $0x48] sm:$0xff]  ;;  %v394_v13 = vld [vmem:[%s580_s2] sm:$0xff]   ;;  %v23_v14 = vrot.slane %v19_v9, 7  ;;  %v25_v19 = vrot.slane %v21_v15, 7  ;;  %v321_v21 = vld [vmem:[%s578_s1 + $0x58] sm:$0xff]  ;;  %v389_v31 = vpack.i.bf16 %v21_v15, %v20_v7 }
   0x5   :  { %234 = vmatpush1.bf16.msra.mxu0 %v394_v13  ;;  %368 = vmatpush1.bf16.msra.mxu1 %v394_v13  ;;  %v395_v17 = vld [vmem:[%s580_s2 + $0x8] sm:$0xff]   ;;  %vm65_vm1 = vcmp.lt.s32.totalorder %v27_v4, 7  ;;  %v62_v24 = vrot.slane %v19_v9, 1  ;;  %v320_v25 = vld [vmem:[%s578_s1 + $0x50] sm:$0xff]  ;;  %v61_v28 = vrot.slane %v18_v8, 1  ;;  %v64_v30 = vrot.slane %v21_v15, 1 }
   0x6   :  { %54 = vperm.xlu1 %383, %v36_v5   ;;  %44 = vperm.xlu0 %382, %v34_v6   ;;  %v474_v18 = vsel %vm28_vm0, %v23_v14, %v24_v10  ;;  %v479_v20 = vsel %vm28_vm0, %v22_v16, %v23_v14  ;;  %v485_v22 = vsel %vm28_vm0, %v25_v19, %v22_v16  ;;  %v396_v27 = vld [vmem:[%s580_s2 + $0x10] sm:$0xff]   ;;  %v397_v36 = vld [vmem:[%s580_s2 + $0x18] sm:$0xff]   ;;  %v398_v37 = vld [vmem:[%s580_s2 + $0x20] sm:$0xff]  }
   0x7   :  { %235 = vmatprep.subr.bf16.mxu0 %v406_v1  ;;  %357 = vmatprep.subr.bf16.mxu1 %v406_v1  ;;  %v488_v23 = vsel %vm28_vm0, %v24_v10, %v25_v19  ;;  %v499_v29 = vsel %vm65_vm1, %v62_v24, %v63_v26  ;;  %v502_v32 = vsel %vm65_vm1, %v61_v28, %v62_v24  ;;  %v399_v38 = vld [vmem:[%s580_s2 + $0x28] sm:$0xff]   ;;  %v400_v39 = vld [vmem:[%s580_s2 + $0x30] sm:$0xff]   ;;  %v401_v40 = vld [vmem:[%s580_s2 + $0x38] sm:$0xff]  }
   0x8   :  { %v384_v33 = vpack.i.bf16 %v19_v9, %v18_v8  ;;  %v505_v34 = vsel %vm65_vm1, %v64_v30, %v61_v28  ;;  %v508_v35 = vsel %vm65_vm1, %v63_v26, %v64_v30  ;;  %v402_v41 = vld [vmem:[%s580_s2 + $0x40] sm:$0xff]   ;;  %v403_v42 = vld [vmem:[%s580_s2 + $0x48] sm:$0xff]   ;;  %v404_v43 = vld [vmem:[%s580_s2 + $0x50] sm:$0xff]  }
   0x9   :  { %236 = vmatpush1.bf16.msra.mxu0 %v395_v17  ;;  %369 = vmatpush1.bf16.msra.mxu1 %v395_v17  ;;  %v405_v44 = vld [vmem:[%s580_s2 + $0x58] sm:$0xff]  }
   0xa   :  { %82 = vperm.xlu1 %383, %v319_v11   ;;  %77 = vperm.xlu0 %382, %v318_v12   ;;  %v322_v11 = vld [vmem:[%s581_s3] ss:$0 sm:$0xff] }
   0xb   :  { %237 = vmatprep.subr.bf16.mxu0 %v406_v1  ;;  %358 = vmatprep.subr.bf16.mxu1 %v406_v1 }
   0xd   :  { %238 = vmatpush1.bf16.msra.mxu0 %v396_v27  ;;  %370 = vmatpush1.bf16.msra.mxu1 %v396_v27 }
   0xe   :  { %92 = vperm.xlu1 %383, %v321_v21   ;;  %87 = vperm.xlu0 %382, %v320_v25  }
   0xf   :  { %239 = vmatprep.subr.bf16.mxu0 %v406_v1  ;;  %359 = vmatprep.subr.bf16.mxu1 %v406_v1 }
  0x11   :  { %240 = vmatpush1.bf16.msra.mxu0 %v397_v36  ;;  %371 = vmatpush1.bf16.msra.mxu1 %v397_v36 }
  0x12   :  { %390 = vrot.lane.b32.xlu1 %v389_v31, %s407_s19  ;;  %385 = vrot.lane.b32.xlu0 %v384_v33, %s407_s19 }
  0x13   :  { %241 = vmatprep.subr.bf16.mxu0 %v406_v1  ;;  %360 = vmatprep.subr.bf16.mxu1 %v406_v1 }
  0x15   :  { %242 = vmatpush1.bf16.msra.mxu0 %v398_v37  ;;  %372 = vmatpush1.bf16.msra.mxu1 %v398_v37 }
  0x16   :  { %243 = vmatprep.subr.bf16.mxu0 %v406_v1  ;;  %361 = vmatprep.subr.bf16.mxu1 %v406_v1 }
  0x19   :  { %244 = vmatpush1.bf16.msra.mxu0 %v399_v38  ;;  %373 = vmatpush1.bf16.msra.mxu1 %v399_v38 }
  0x1a   :  { %245 = vmatprep.subr.bf16.mxu0 %v406_v1  ;;  %362 = vmatprep.subr.bf16.mxu1 %v406_v1 }
  0x1d   :  { %246 = vmatpush1.bf16.msra.mxu0 %v400_v39  ;;  %374 = vmatpush1.bf16.msra.mxu1 %v400_v39 }
  0x1e   :  { %247 = vmatprep.subr.bf16.mxu0 %v406_v1  ;;  %363 = vmatprep.subr.bf16.mxu1 %v406_v1 }
  0x21   :  { %248 = vmatpush1.bf16.msra.mxu0 %v401_v40  ;;  %375 = vmatpush1.bf16.msra.mxu1 %v401_v40 }
  0x22   :  { %249 = vmatprep.subr.bf16.mxu0 %v406_v1  ;;  %364 = vmatprep.subr.bf16.mxu1 %v406_v1 }
  0x25   :  { %250 = vmatpush1.bf16.msra.mxu0 %v402_v41  ;;  %376 = vmatpush1.bf16.msra.mxu1 %v402_v41 }
  0x26   :  { %251 = vmatprep.subr.bf16.mxu0 %v406_v1  ;;  %365 = vmatprep.subr.bf16.mxu1 %v406_v1 }
  0x29   :  { %252 = vmatpush1.bf16.msra.mxu0 %v403_v42  ;;  %377 = vmatpush1.bf16.msra.mxu1 %v403_v42 }
  0x2a   :  { %253 = vmatprep.subr.bf16.mxu0 %v406_v1  ;;  %366 = vmatprep.subr.bf16.mxu1 %v406_v1 }
  0x2d   :  { %254 = vmatpush1.bf16.msra.mxu0 %v404_v43  ;;  %378 = vmatpush1.bf16.msra.mxu1 %v404_v43 }
  0x2e   :  { %255 = vmatprep.subr.bf16.mxu0 %v406_v1  ;;  %367 = vmatprep.subr.bf16.mxu1 %v406_v1 }
  0x31   :  { %256 = vmatpush1.bf16.msra.mxu0 %v405_v44  ;;  %379 = vmatpush1.bf16.msra.mxu1 %v405_v44 }
  0x81   :  { %v50_v45 = vpop.permute.xlu1 %49  ;;  %v40_v46 = vpop.permute.xlu0 %39 }
  0x82   :  { %v59_v59 = vmul.f32 %v50_v45, %v474_v18  ;;  %v57_v60 = vmul.f32 %v40_v46, %v485_v22 }
  0x85   :  { %v55_v47 = vpop.permute.xlu1 %54  ;;  %v45_v48 = vpop.permute.xlu0 %44 }
  0x86   :  { %v60_v61 = vmul.f32 %v55_v47, %v488_v23  ;;  %v58_v62 = vmul.f32 %v45_v48, %v479_v20 }
  0x89   :  { %v83_v49 = vpop.permute.xlu1 %82  ;;  %v78_v50 = vpop.permute.xlu0 %77 }
  0x8a   :  { %v96_v51 = vmul.f32 %v83_v49, %v499_v29  ;;  %v95_v52 = vmul.f32 %v78_v50, %v502_v32 }
  0x8c   :  { %v121_v53 = vpack.c.bf16 %v96_v51, %v95_v52 }
  0x8d   :  { %v93_v54 = vpop.permute.xlu1 %92  ;;  %v88_v55 = vpop.permute.xlu0 %87 }
  0x8e   :  { %v98_v56 = vmul.f32 %v93_v54, %v505_v34  ;;  %v97_v57 = vmul.f32 %v88_v55, %v508_v35  ;;  %335 = vmatprep.mubr.msk.bf16.mxu0 %vm115_vm2, %v121_v53 }
  0x90   :  { %v123_v58 = vpack.c.bf16 %v98_v56, %v97_v57 }
  0x91   :  { %v391_v63 = vpop.permute.xlu1 %390  ;;  %v386_v0 = vpop.permute.xlu0 %385 }
  0x92   :  { %v393_v1 = vunpack.i.h.bf16 %v391_v63  ;;  %v392_v2 = vunpack.i.l.bf16 %v391_v63  ;;  %v388_v3 = vunpack.i.h.bf16 %v386_v0  ;;  %v387_v4 = vunpack.i.l.bf16 %v386_v0  ;;  %336 = vmatprep.mubr.msk.bf16.mxu1 %vm115_vm2, %v123_v58 }
  0x94   :  { %v116_v5 = vsel %vm115_vm2, %v57_v60, %v387_v4  ;;  %v117_v6 = vsel %vm115_vm2, %v58_v62, %v388_v3  ;;  %v118_v7 = vsel %vm115_vm2, %v59_v59, %v392_v2  ;;  %v119_v8 = vsel %vm115_vm2, %v60_v61, %v393_v1 }
  0x95   :  { %v120_v9 = vpack.c.bf16 %v117_v6, %v116_v5  ;;  %v122_v10 = vpack.c.bf16 %v119_v8, %v118_v7 }
  0x97   :  { %266 = vmatmul.mubr.bf16.vlgmr.msra.gmra.mrb[0].mxu0 %v120_v9  ;;  %274 = vmatmul.mubr.bf16.vlgmr.msra.gmra.mrb[0].mxu1 %v122_v10 }
 0x16a   :  { %v267_v12 = vpop.f32.mrb[0].mxu0  ;;  %v275_v13 = vpop.f32.mrb[0].mxu1 }
 0x16b   :  { %v268_v14 = vadd.f32 %v322_v11, %v267_v12  ;;  %v276_v15 = vadd.f32 %v322_v11, %v275_v13  ;;  %v269_v16 = vpop.f32.mrb[1].mxu0  ;;  %v277_v17 = vpop.f32.mrb[1].mxu1 }
 0x16c   :  { %v270_v18 = vpop.f32.mrb[2].mxu0  ;;  %v278_v19 = vpop.f32.mrb[2].mxu1 }
 0x16d   :  { %v286_v20 = vmul.f32 0.01, %v268_v14  ;;  %v288_v21 = vmul.f32 0.01, %v276_v15  ;;  %v271_v22 = vadd.f32 %v322_v11, %v270_v18  ;;  %v279_v23 = vadd.f32 %v322_v11, %v278_v19  ;;  %v272_v24 = vpop.f32.mrb[3].mxu0  ;;  %v280_v25 = vpop.f32.mrb[3].mxu1 }
 0x16e   :  { %vm282_vm3 = vcmp.gt.f32.partialorder %v268_v14, 0.0  ;;  %vm284_vm4 = vcmp.gt.f32.partialorder %v276_v15, 0.0 }
 0x16f   :  { %vm283_vm5 = vcmp.gt.f32.partialorder %v271_v22, 0.0  ;;  %v287_v26 = vmul.f32 0.01, %v271_v22  ;;  %vm285_vm6 = vcmp.gt.f32.partialorder %v279_v23, 0.0  ;;  %v289_v27 = vmul.f32 0.01, %v279_v23 }
 0x170   :  { %v290_v28 = vsel %vm282_vm3, %v268_v14, %v286_v20  ;;  %v292_v29 = vsel %vm284_vm4, %v276_v15, %v288_v21 }
 0x171   :  { %v291_v30 = vsel %vm283_vm5, %v271_v22, %v287_v26  ;;  %v293_v31 = vsel %vm285_vm6, %v279_v23, %v289_v27 }
 0x172   :  { %v348_v32 = vpack.c.bf16 %v291_v30, %v290_v28  ;;  %v353_v33 = vpack.c.bf16 %v293_v31, %v292_v29 }
 0x174   :  { %349 = vst [vmem:[%s582_s4] sm:$0xff] %v348_v32   ;;  %355 = vst [vmem:[%s582_s4 + $0x8] sm:$0xff] %v353_v33  }

</bundles_post_ra>
